<compile_context>
chip_gen: v7x
topology: tpu7x:2x2x1
jax: 0.10.0
libtpu: 0.0.40
codegen_flags: <defaults>
</compile_context>

<pallas_src>
import jax
import jax.numpy as jnp
from jax.experimental import pallas as pl
from jax.experimental.pallas import tpu as pltpu

IN_FEATURES = 2048


def _round_up(x, m):
    return (x + m - 1) // m * m


def _fc_kernel(x_ref, w_ref, b_ref, o_ref):
    # x_ref: (TB, K) bf16   w_ref: (TC, K) bf16   b_ref: (1, TC) f32   o_ref: (TB, TC) f32
    # Contract K (last dim of BOTH operands) => x @ w.T with no transpose op.
    acc = jax.lax.dot_general(
        x_ref[...], w_ref[...],
        dimension_numbers=(((1,), (1,)), ((), ())),
        preferred_element_type=jnp.float32,
    )
    o_ref[...] = (acc + b_ref[...]).astype(o_ref.dtype)


def fc_forward(x, w, b):
    """y = x @ w.T + b   (PyTorch nn.Linear(2048, num_class) semantics).

    x: (..., 2048) f32, w: (C, 2048) f32, b: (C,) f32 -> (..., C) f32
    """
    lead_shape = x.shape[:-1]
    K = x.shape[-1]
    C, K2 = w.shape
    assert K == K2 == IN_FEATURES

    x2d = x.reshape(-1, K)
    B = x2d.shape[0]

    # Pick tiles first, then pad to exact multiples of the tiles (avoids the
    # pathological "one giant tile" case for awkward batch sizes).
    TB = 256 if B >= 256 else _round_up(max(B, 1), 16)      # bf16 sublane tile = 16
    TC = 512 if C >= 512 else _round_up(max(C, 1), 128)     # lane-dense output tile
    B_pad = _round_up(B, TB)
    C_pad = _round_up(C, TC)

    # bf16 operands (full-rate MXU, half the weight bytes streamed); f32 bias/acc.
    x_p = jnp.pad(x2d.astype(jnp.bfloat16), ((0, B_pad - B), (0, 0)))
    w_p = jnp.pad(w.astype(jnp.bfloat16), ((0, C_pad - C), (0, 0)))
    b_p = jnp.pad(b.astype(jnp.float32), (0, C_pad - C)).reshape(1, C_pad)

    grid = (B_pad // TB, C_pad // TC)
    flops = 2 * B_pad * C_pad * K
    bytes_accessed = (B_pad * K * 2) + (C_pad * K * 2) + (C_pad * 4) + (B_pad * C_pad * 4)

    out = pl.pallas_call(
        _fc_kernel,
        out_shape=jax.ShapeDtypeStruct((B_pad, C_pad), jnp.float32),
        grid=grid,
        in_specs=[
            pl.BlockSpec((TB, K), lambda i, j: (i, 0)),   # x row block, full K
            pl.BlockSpec((TC, K), lambda i, j: (j, 0)),   # weight tile, native (C, K) layout
            pl.BlockSpec((1, TC), lambda i, j: (0, j)),   # bias tile
        ],
        out_specs=pl.BlockSpec((TB, TC), lambda i, j: (i, j)),
        compiler_params=pltpu.CompilerParams(
            dimension_semantics=("parallel", "parallel"),   # both axes megacore-shardable
            vmem_limit_bytes=32 * 1024 * 1024,              # tiles ~7 MiB double-buffered
        ),
        cost_estimate=pl.CostEstimate(
            flops=flops, transcendentals=0, bytes_accessed=bytes_accessed),
    )(x_p, w_p, b_p)

    return out[:B, :C].reshape(*lead_shape, C)


if __name__ == "__main__":
    num_class = 16
    batch = 8

    key = jax.random.PRNGKey(0)
    kx, kw, kb = jax.random.split(key, 3)

    # Deterministic init matching PyTorch Linear's uniform(-1/sqrt(K), 1/sqrt(K)) range.
    bound = 1.0 / (IN_FEATURES ** 0.5)
    w = jax.random.uniform(kw, (num_class, IN_FEATURES), jnp.float32, -bound, bound)
    b = jax.random.uniform(kb, (num_class,), jnp.float32, -bound, bound)
    x = jax.random.normal(kx, (batch, IN_FEATURES), jnp.float32)

    fc = jax.jit(fc_forward)
    y = fc(x, w, b)
    jax.block_until_ready(y)
    assert y.shape == (batch, num_class)

    # Tight check vs the same bf16-operand / f32-accumulate reference.
    xb = x.astype(jnp.bfloat16).astype(jnp.float32)
    wb = w.astype(jnp.bfloat16).astype(jnp.float32)
    y_bf16_ref = xb @ wb.T + b
    assert jnp.allclose(y, y_bf16_ref, atol=2e-3, rtol=2e-3)

    # Loose sanity check vs the full-precision (PyTorch-equivalent) f32 reference.
    y_f32_ref = x @ w.T + b
    assert jnp.allclose(y, y_f32_ref, atol=5e-2, rtol=5e-2)

    print("KERNEL_OK")
</pallas_src>

<mosaic_0001>
module attributes {stable_mosaic.version = 11 : i64} {
  func.func @_fc_kernel(%arg0: i32, %arg1: i32, %arg2: memref<16x2048xbf16, #tpu.memory_space<vmem>>, %arg3: memref<128x2048xbf16, #tpu.memory_space<vmem>>, %arg4: memref<1x128xf32, #tpu.memory_space<vmem>>, %arg5: memref<16x128xf32, #tpu.memory_space<vmem>>) attributes {dimension_semantics = [#tpu.dimension_semantics<parallel>, #tpu.dimension_semantics<parallel>], iteration_bounds = array<i64: 1, 1>, scalar_prefetch = 0 : i64, scratch_operands = 0 : i64, tpu.core_type = #tpu.core_type<tc>, window_params = [{transform_indices = @transform_0, window_bounds = array<i64: 16, 2048>}, {transform_indices = @transform_1, window_bounds = array<i64: 128, 2048>}, {transform_indices = @transform_2, window_bounds = array<i64: 1, 128>}, {transform_indices = @transform_3, window_bounds = array<i64: 16, 128>}]} {
    %c0 = arith.constant 0 : index
    %c0_0 = arith.constant 0 : index
    %0 = vector.load %arg2[%c0, %c0_0] : memref<16x2048xbf16, #tpu.memory_space<vmem>>, vector<16x2048xbf16>
    %c0_1 = arith.constant 0 : index
    %c0_2 = arith.constant 0 : index
    %1 = vector.load %arg3[%c0_1, %c0_2] : memref<128x2048xbf16, #tpu.memory_space<vmem>>, vector<128x2048xbf16>
    %cst = arith.constant dense<0.000000e+00> : vector<16x128xf32>
    %2 = tpu.matmul %0, %1, %cst {dimension_numbers = #tpu.dot_dimension_numbers<[1], [1], [0], [0], [0, 0, 1, 0], [], []>} : vector<16x2048xbf16>, vector<128x2048xbf16>, vector<16x128xf32> -> vector<16x128xf32>
    %c0_3 = arith.constant 0 : index
    %c0_4 = arith.constant 0 : index
    %3 = vector.load %arg4[%c0_3, %c0_4] : memref<1x128xf32, #tpu.memory_space<vmem>>, vector<1x128xf32>
    %4 = vector.broadcast %3 : vector<1x128xf32> to vector<16x128xf32>
    %5 = arith.addf %2, %4 : vector<16x128xf32>
    %c0_5 = arith.constant 0 : index
    %c0_6 = arith.constant 0 : index
    %6 = vector.load %arg5[%c0_5, %c0_6] : memref<16x128xf32, #tpu.memory_space<vmem>>, vector<16x128xf32>
    tpu.vector_store %arg5[%c0_5, %c0_6], %5 {strides = array<i32>} : memref<16x128xf32, #tpu.memory_space<vmem>>, vector<16x128xf32>,
    return
  }
  func.func @transform_0(%arg0: i32, %arg1: i32) -> (i32, i32) {
    %c0_i32 = arith.constant 0 : i32
    %c0_i32_0 = arith.constant 0 : i32
    return %arg0, %c0_i32 : i32, i32
  }
  func.func @transform_1(%arg0: i32, %arg1: i32) -> (i32, i32) {
    %c0_i32 = arith.constant 0 : i32
    %c0_i32_0 = arith.constant 0 : i32
    return %arg1, %c0_i32 : i32, i32
  }
  func.func @transform_2(%arg0: i32, %arg1: i32) -> (i32, i32) {
    %c0_i32 = arith.constant 0 : i32
    %c0_i32_0 = arith.constant 0 : i32
    return %c0_i32, %arg1 : i32, i32
  }
  func.func @transform_3(%arg0: i32, %arg1: i32) -> (i32, i32) {
    %c0_i32 = arith.constant 0 : i32
    return %arg0, %arg1 : i32, i32
  }
}

</mosaic_0001>

<bundles_post_ra>
// kernel: fc_forward.1
= control target key start
LH: loop header
LB: loop body
LE: loop exit
PB: predicated region body
PF: predicated region fallthrough
CT: control target
= control target key end

     0   :  { %s1918_s1 = inlined_call_operand.vmem [shape: bf16[128,2048], index: 1, kind: input, shape index: {}]   ;;  %s1919_s0 = inlined_call_operand.vmem [shape: bf16[16,2048], index: 0, kind: input, shape index: {}]   ;;  %s1920_s2 = inlined_call_operand.vmem [shape: f32[1,128], index: 2, kind: input, shape index: {}]   ;;  %s1921_s3 = inlined_call_operand.vmem [shape: f32[16,128], index: 3, kind: output, shape index: {}]  }
   0x1   :  { %v31_v0 = vld [vmem:[%s1918_s1] sm:$0xff] }
   0x2   :  { %v39_v1 = vld [vmem:[%s1918_s1 + $0x40] sm:$0xff] }
   0x3   :  { %v35_v2 = vld [vmem:[%s1918_s1 + $0x20] sm:$0xff]  ;;  %v1238_v3 = vcombine.high %v31_v0, %v39_v1  ;;  %v1237_v5 = vcombine.low %v31_v0, %v39_v1 }
   0x4   :  { %v43_v4 = vld [vmem:[%s1918_s1 + $0x60] sm:$0xff] }
   0x5   :  { %v47_v6 = vld [vmem:[%s1918_s1 + $0x80] sm:$0xff]  ;;  %v1246_v8 = vcombine.high %v35_v2, %v43_v4  ;;  %v1245_v9 = vcombine.low %v35_v2, %v43_v4  ;;  %886 = vmatprep.subr.bf16.mxu1 %v1238_v3  ;;  %v32_v4 = vld [vmem:[%s1918_s1 + $0x8] sm:$0xff] }
   0x6   :  { %v55_v7 = vld [vmem:[%s1918_s1 + $0xc0] sm:$0xff]  ;;  %887 = vmatpush1.bf16.xpose.msra.mxu1 %v1237_v5  ;;  %v40_v5 = vld [vmem:[%s1918_s1 + $0x48] sm:$0xff] }
   0x7   :  { %v1254_v10 = vcombine.high %v47_v6, %v55_v7  ;;  %v51_v11 = vld [vmem:[%s1918_s1 + $0xa0] sm:$0xff]  ;;  %1050 = vmatprep.subr.bf16.mxu0 %v1246_v8  ;;  %v1253_v18 = vcombine.low %v47_v6, %v55_v7  ;;  %v36_v6 = vld [vmem:[%s1918_s1 + $0x28] sm:$0xff] }
   0x8   :  { %v59_v12 = vld [vmem:[%s1918_s1 + $0xe0] sm:$0xff]  ;;  %1051 = vmatpush1.bf16.xpose.msra.mxu0 %v1245_v9  ;;  %v44_v7 = vld [vmem:[%s1918_s1 + $0x68] sm:$0xff] }
   0x9   :  { %v1262_v13 = vcombine.high %v51_v11, %v59_v12  ;;  %888 = vmatprep.subr.bf16.mxu1 %v1254_v10  ;;  %v63_v14 = vld [vmem:[%s1918_s1 + $0x100] sm:$0xff]  ;;  %v1261_v19 = vcombine.low %v51_v11, %v59_v12  ;;  %v1240_v10 = vcombine.high %v32_v4, %v40_v5  ;;  %v1248_v11 = vcombine.high %v36_v6, %v44_v7  ;;  %v48_v12 = vld [vmem:[%s1918_s1 + $0x88] sm:$0xff] }
   0xa   :  { %v71_v15 = vld [vmem:[%s1918_s1 + $0x140] sm:$0xff] }
   0xb   :  { %1052 = vmatprep.subr.bf16.mxu0 %v1262_v13  ;;  %v67_v16 = vld [vmem:[%s1918_s1 + $0x120] sm:$0xff]  ;;  %v1270_v20 = vcombine.high %v63_v14, %v71_v15  ;;  %v1269_v32 = vcombine.low %v63_v14, %v71_v15  ;;  %v56_v13 = vld [vmem:[%s1918_s1 + $0xc8] sm:$0xff] }
   0xc   :  { %v75_v17 = vld [vmem:[%s1918_s1 + $0x160] sm:$0xff]  ;;  %v52_v14 = vld [vmem:[%s1918_s1 + $0xa8] sm:$0xff] }
   0xd   :  { %v1278_v21 = vcombine.high %v67_v16, %v75_v17  ;;  %v1452_v22 = vld [vmem:[%s1919_s0] sm:$0xff]  ;;  %v1277_v33 = vcombine.low %v67_v16, %v75_v17  ;;  %v60_v16 = vld [vmem:[%s1918_s1 + $0xe8] sm:$0xff] }
   0xe   :  { %v1457_v23 = vld [vmem:[%s1919_s0 + $0x40] sm:$0xff]  ;;  %889 = vmatpush1.bf16.xpose.msra.mxu1 %v1253_v18  ;;  %v1562_v17 = vld [vmem:[%s1919_s0 + $0x8] sm:$0xff] }
   0xf   :  { %v1222_v24 = vcombine.high %v1452_v22, %v1457_v23  ;;  %v1464_v25 = vld [vmem:[%s1919_s0 + $0x20] sm:$0xff]  ;;  %890 = vmatprep.subr.bf16.mxu1 %v1270_v20  ;;  %v1221_v15 = vcombine.low %v1452_v22, %v1457_v23  ;;  %v1567_v18 = vld [vmem:[%s1919_s0 + $0x48] sm:$0xff]  ;;  %v1247_v23 = vcombine.low %v36_v6, %v44_v7 }
  0x10   :  { %v1469_v26 = vld [vmem:[%s1919_s0 + $0x60] sm:$0xff]  ;;  %1053 = vmatpush1.bf16.xpose.msra.mxu0 %v1261_v19  ;;  %v1239_v19 = vcombine.low %v32_v4, %v40_v5  ;;  %v1579_v22 = vld [vmem:[%s1919_s0 + $0x68] sm:$0xff] }
  0x11   :  { %v1230_v27 = vcombine.high %v1464_v25, %v1469_v26  ;;  %1054 = vmatprep.subr.bf16.mxu0 %v1278_v21  ;;  %v79_v28 = vld [vmem:[%s1918_s1 + $0x180] sm:$0xff]  ;;  %918 = vmatprep.mubr.bf16.mxu1 %v1222_v24  ;;  %v1229_v20 = vcombine.low %v1464_v25, %v1469_v26  ;;  %v1574_v21 = vld [vmem:[%s1919_s0 + $0x28] sm:$0xff]  ;;  %v1256_v24 = vcombine.high %v48_v12, %v56_v13 }
  0x12   :  { %v87_v29 = vld [vmem:[%s1918_s1 + $0x1c0] sm:$0xff]  ;;  %v1232_v25 = vcombine.high %v1574_v21, %v1579_v22  ;;  %v64_v26 = vld [vmem:[%s1918_s1 + $0x108] sm:$0xff] }
  0x13   :  { %v83_v30 = vld [vmem:[%s1918_s1 + $0x1a0] sm:$0xff]  ;;  %1082 = vmatprep.mubr.bf16.mxu0 %v1230_v27  ;;  %v1286_v34 = vcombine.high %v79_v28, %v87_v29  ;;  %v1285_v40 = vcombine.low %v79_v28, %v87_v29  ;;  %v1264_v27 = vcombine.high %v52_v14, %v60_v16  ;;  %v1224_v28 = vcombine.high %v1562_v17, %v1567_v18  ;;  %v72_v29 = vld [vmem:[%s1918_s1 + $0x148] sm:$0xff] }
  0x14   :  { %v91_v31 = vld [vmem:[%s1918_s1 + $0x1e0] sm:$0xff]  ;;  %v144_v4 = vld [vmem:[%s1918_s1 + $0x388] sm:$0xff] }
  0x15   :  { %v1294_v35 = vcombine.high %v83_v30, %v91_v31  ;;  %v95_v36 = vld [vmem:[%s1918_s1 + $0x200] sm:$0xff]  ;;  %v1293_v41 = vcombine.low %v83_v30, %v91_v31  ;;  %v68_v30 = vld [vmem:[%s1918_s1 + $0x128] sm:$0xff] }
  0x16   :  { %891 = vmatpush1.bf16.xpose.msra.mxu1 %v1269_v32  ;;  %v103_v37 = vld [vmem:[%s1918_s1 + $0x240] sm:$0xff]  ;;  %v76_v31 = vld [vmem:[%s1918_s1 + $0x168] sm:$0xff]  ;;  %v1255_v32 = vcombine.low %v48_v12, %v56_v13  ;;  %v33_v12 = vld [vmem:[%s1918_s1 + $0x10] sm:$0xff] }
  0x17   :  { %892 = vmatprep.subr.bf16.mxu1 %v1286_v34  ;;  %v99_v38 = vld [vmem:[%s1918_s1 + $0x220] sm:$0xff]  ;;  %v1302_v42 = vcombine.high %v95_v36, %v103_v37  ;;  %v1301_v48 = vcombine.low %v95_v36, %v103_v37  ;;  %v1272_v34 = vcombine.high %v64_v26, %v72_v29  ;;  %v80_v36 = vld [vmem:[%s1918_s1 + $0x188] sm:$0xff]  ;;  %v41_v13 = vld [vmem:[%s1918_s1 + $0x50] sm:$0xff] }
  0x18   :  { %1055 = vmatpush1.bf16.xpose.msra.mxu0 %v1277_v33  ;;  %v107_v39 = vld [vmem:[%s1918_s1 + $0x260] sm:$0xff]  ;;  %v1263_v33 = vcombine.low %v52_v14, %v60_v16  ;;  %v88_v37 = vld [vmem:[%s1918_s1 + $0x1c8] sm:$0xff]  ;;  %v37_v14 = vld [vmem:[%s1918_s1 + $0x30] sm:$0xff] }
  0x19   :  { %1056 = vmatprep.subr.bf16.mxu0 %v1294_v35  ;;  %v1310_v43 = vcombine.high %v99_v38, %v107_v39  ;;  %v111_v44 = vld [vmem:[%s1918_s1 + $0x280] sm:$0xff]  ;;  %v1309_v49 = vcombine.low %v99_v38, %v107_v39  ;;  %v1280_v35 = vcombine.high %v68_v30, %v76_v31  ;;  %v84_v38 = vld [vmem:[%s1918_s1 + $0x1a8] sm:$0xff] }
  0x1a   :  { %v119_v45 = vld [vmem:[%s1918_s1 + $0x2c0] sm:$0xff]  ;;  %v92_v39 = vld [vmem:[%s1918_s1 + $0x1e8] sm:$0xff] }
  0x1b   :  { %v115_v46 = vld [vmem:[%s1918_s1 + $0x2a0] sm:$0xff]  ;;  %v1318_v50 = vcombine.high %v111_v44, %v119_v45  ;;  %v1317_v56 = vcombine.low %v111_v44, %v119_v45  ;;  %v96_v44 = vld [vmem:[%s1918_s1 + $0x208] sm:$0xff] }
  0x1c   :  { %v123_v47 = vld [vmem:[%s1918_s1 + $0x2e0] sm:$0xff]  ;;  %v104_v45 = vld [vmem:[%s1918_s1 + $0x248] sm:$0xff] }
  0x1d   :  { %v1326_v51 = vcombine.high %v115_v46, %v123_v47  ;;  %v127_v52 = vld [vmem:[%s1918_s1 + $0x300] sm:$0xff]  ;;  %v1325_v57 = vcombine.low %v115_v46, %v123_v47  ;;  %v100_v46 = vld [vmem:[%s1918_s1 + $0x228] sm:$0xff] }
  0x1e   :  { %893 = vmatpush1.bf16.xpose.msra.mxu1 %v1285_v40  ;;  %v135_v53 = vld [vmem:[%s1918_s1 + $0x340] sm:$0xff]  ;;  %v1271_v40 = vcombine.low %v64_v26, %v72_v29  ;;  %v108_v47 = vld [vmem:[%s1918_s1 + $0x268] sm:$0xff]  ;;  %v61_v26 = vld [vmem:[%s1918_s1 + $0xf0] sm:$0xff] }
  0x1f   :  { %894 = vmatprep.subr.bf16.mxu1 %v1302_v42  ;;  %v131_v54 = vld [vmem:[%s1918_s1 + $0x320] sm:$0xff]  ;;  %v1334_v58 = vcombine.high %v127_v52, %v135_v53  ;;  %v1333_v0 = vcombine.low %v127_v52, %v135_v53  ;;  %v1288_v42 = vcombine.high %v80_v36, %v88_v37  ;;  %v112_v52 = vld [vmem:[%s1918_s1 + $0x288] sm:$0xff]  ;;  %v1686_v29 = vld [vmem:[%s1919_s0 + $0x10] sm:$0xff] }
  0x20   :  { %1057 = vmatpush1.bf16.xpose.msra.mxu0 %v1293_v41  ;;  %v139_v55 = vld [vmem:[%s1918_s1 + $0x360] sm:$0xff]  ;;  %v1279_v41 = vcombine.low %v68_v30, %v76_v31  ;;  %v120_v53 = vld [vmem:[%s1918_s1 + $0x2c8] sm:$0xff]  ;;  %v1691_v30 = vld [vmem:[%s1919_s0 + $0x50] sm:$0xff]  ;;  %v1241_v31 = vcombine.low %v33_v12, %v41_v13 }
  0x21   :  { %1058 = vmatprep.subr.bf16.mxu0 %v1310_v43  ;;  %v1342_v59 = vcombine.high %v131_v54, %v139_v55  ;;  %v143_v60 = vld [vmem:[%s1918_s1 + $0x380] sm:$0xff]  ;;  %v1341_v1 = vcombine.low %v131_v54, %v139_v55  ;;  %v1296_v43 = vcombine.high %v84_v38, %v92_v39  ;;  %v116_v54 = vld [vmem:[%s1918_s1 + $0x2a8] sm:$0xff] }
  0x22   :  { %v151_v61 = vld [vmem:[%s1918_s1 + $0x3c0] sm:$0xff]  ;;  %v124_v55 = vld [vmem:[%s1918_s1 + $0x2e8] sm:$0xff] }
  0x23   :  { %v147_v62 = vld [vmem:[%s1918_s1 + $0x3a0] sm:$0xff]  ;;  %v1350_v2 = vcombine.high %v143_v60, %v151_v61  ;;  %v1349_v8 = vcombine.low %v143_v60, %v151_v61  ;;  %v128_v60 = vld [vmem:[%s1918_s1 + $0x308] sm:$0xff] }
  0x24   :  { %v155_v63 = vld [vmem:[%s1918_s1 + $0x3e0] sm:$0xff]  ;;  %v136_v61 = vld [vmem:[%s1918_s1 + $0x348] sm:$0xff] }
  0x25   :  { %v1358_v3 = vcombine.high %v147_v62, %v155_v63  ;;  %v1357_v9 = vcombine.low %v147_v62, %v155_v63  ;;  %v132_v62 = vld [vmem:[%s1918_s1 + $0x328] sm:$0xff] }
  0x26   :  { %895 = vmatpush1.bf16.xpose.msra.mxu1 %v1301_v48  ;;  %v1287_v48 = vcombine.low %v80_v36, %v88_v37  ;;  %v140_v63 = vld [vmem:[%s1918_s1 + $0x368] sm:$0xff]  ;;  %v1226_v36 = vcombine.high %v1686_v29, %v1691_v30  ;;  %v73_v37 = vld [vmem:[%s1918_s1 + $0x150] sm:$0xff] }
  0x27   :  { %896 = vmatprep.subr.bf16.mxu1 %v1318_v50  ;;  %v1304_v50 = vcombine.high %v96_v44, %v104_v45  ;;  %v152_v5 = vld [vmem:[%s1918_s1 + $0x3c8] sm:$0xff] }
  0x28   :  { %1059 = vmatpush1.bf16.xpose.msra.mxu0 %v1309_v49  ;;  %v1295_v49 = vcombine.low %v84_v38, %v92_v39  ;;  %v148_v6 = vld [vmem:[%s1918_s1 + $0x3a8] sm:$0xff]  ;;  %v1351_v16 = vcombine.low %v144_v4, %v152_v5  ;;  %v69_v38 = vld [vmem:[%s1918_s1 + $0x130] sm:$0xff] }
  0x29   :  { %1060 = vmatprep.subr.bf16.mxu0 %v1326_v51  ;;  %v1312_v51 = vcombine.high %v100_v46, %v108_v47  ;;  %v156_v7 = vld [vmem:[%s1918_s1 + $0x3e8] sm:$0xff]  ;;  %v77_v39 = vld [vmem:[%s1918_s1 + $0x170] sm:$0xff] }
  0x2e   :  { %897 = vmatpush1.bf16.xpose.msra.mxu1 %v1317_v56  ;;  %v1303_v56 = vcombine.low %v96_v44, %v104_v45  ;;  %v81_v44 = vld [vmem:[%s1918_s1 + $0x190] sm:$0xff] }
  0x2f   :  { %898 = vmatprep.subr.bf16.mxu1 %v1334_v58  ;;  %v1320_v58 = vcombine.high %v112_v52, %v120_v53  ;;  %v89_v45 = vld [vmem:[%s1918_s1 + $0x1d0] sm:$0xff] }
  0x30   :  { %1061 = vmatpush1.bf16.xpose.msra.mxu0 %v1325_v57  ;;  %v1311_v57 = vcombine.low %v100_v46, %v108_v47  ;;  %v85_v46 = vld [vmem:[%s1918_s1 + $0x1b0] sm:$0xff] }
  0x31   :  { %1062 = vmatprep.subr.bf16.mxu0 %v1342_v59  ;;  %v1328_v59 = vcombine.high %v116_v54, %v124_v55  ;;  %v93_v47 = vld [vmem:[%s1918_s1 + $0x1f0] sm:$0xff] }
  0x36   :  { %899 = vmatpush1.bf16.xpose.msra.mxu1 %v1333_v0  ;;  %v1319_v0 = vcombine.low %v112_v52, %v120_v53  ;;  %v97_v52 = vld [vmem:[%s1918_s1 + $0x210] sm:$0xff] }
  0x37   :  { %900 = vmatprep.subr.bf16.mxu1 %v1350_v2  ;;  %v1336_v2 = vcombine.high %v128_v60, %v136_v61  ;;  %v105_v53 = vld [vmem:[%s1918_s1 + $0x250] sm:$0xff] }
  0x38   :  { %1063 = vmatpush1.bf16.xpose.msra.mxu0 %v1341_v1  ;;  %v1327_v1 = vcombine.low %v116_v54, %v124_v55  ;;  %v101_v54 = vld [vmem:[%s1918_s1 + $0x230] sm:$0xff] }
  0x39   :  { %1064 = vmatprep.subr.bf16.mxu0 %v1358_v3  ;;  %v1344_v3 = vcombine.high %v132_v62, %v140_v63  ;;  %v109_v55 = vld [vmem:[%s1918_s1 + $0x270] sm:$0xff] }
  0x3e   :  { %901 = vmatpush1.bf16.xpose.msra.mxu1 %v1349_v8  ;;  %v1335_v8 = vcombine.low %v128_v60, %v136_v61  ;;  %v113_v60 = vld [vmem:[%s1918_s1 + $0x290] sm:$0xff] }
  0x3f   :  { %927 = vmatprep.subr.bf16.mxu1 %v1240_v10  ;;  %v1352_v10 = vcombine.high %v144_v4, %v152_v5  ;;  %v121_v61 = vld [vmem:[%s1918_s1 + $0x2d0] sm:$0xff] }
  0x40   :  { %1065 = vmatpush1.bf16.xpose.msra.mxu0 %v1357_v9  ;;  %v1343_v9 = vcombine.low %v132_v62, %v140_v63  ;;  %v117_v62 = vld [vmem:[%s1918_s1 + $0x2b0] sm:$0xff] }
  0x41   :  { %1091 = vmatprep.subr.bf16.mxu0 %v1248_v11  ;;  %v1360_v11 = vcombine.high %v148_v6, %v156_v7  ;;  %v125_v63 = vld [vmem:[%s1918_s1 + $0x2f0] sm:$0xff] }
  0x42   :  { %v129_v4 = vld [vmem:[%s1918_s1 + $0x310] sm:$0xff] }
  0x43   :  { %v137_v5 = vld [vmem:[%s1918_s1 + $0x350] sm:$0xff] }
  0x45   :  { %919 = vmatmul.mubr.bf16.vlgmr.msra.gmra.mrb[0].mxu1 %v1221_v15  ;;  %v45_v15 = vld [vmem:[%s1918_s1 + $0x70] sm:$0xff] }
  0x46   :  { %928 = vmatpush1.bf16.xpose.msra.mxu1 %v1239_v19  ;;  %959 = vmatprep.mubr.bf16.mxu1 %v1224_v28  ;;  %v1359_v19 = vcombine.low %v148_v6, %v156_v7  ;;  %v53_v28 = vld [vmem:[%s1918_s1 + $0xb0] sm:$0xff] }
  0x47   :  { %1083 = vmatmul.mubr.bf16.vlgmr.msra.gmra.mrb[0].mxu0 %v1229_v20  ;;  %929 = vmatprep.subr.bf16.mxu1 %v1256_v24  ;;  %v1242_v20 = vcombine.high %v33_v12, %v41_v13  ;;  %v49_v24 = vld [vmem:[%s1918_s1 + $0x90] sm:$0xff] }
  0x48   :  { %1092 = vmatpush1.bf16.xpose.msra.mxu0 %v1247_v23  ;;  %1123 = vmatprep.mubr.bf16.mxu0 %v1232_v25  ;;  %v1250_v23 = vcombine.high %v37_v14, %v45_v15  ;;  %v1223_v25 = vcombine.low %v1562_v17, %v1567_v18  ;;  %v1698_v17 = vld [vmem:[%s1919_s0 + $0x30] sm:$0xff] }
  0x49   :  { %1093 = vmatprep.subr.bf16.mxu0 %v1264_v27  ;;  %v57_v27 = vld [vmem:[%s1918_s1 + $0xd0] sm:$0xff] }
  0x4a   :  { %v1703_v18 = vld [vmem:[%s1919_s0 + $0x70] sm:$0xff] }
  0x4b   :  { %v133_v6 = vld [vmem:[%s1918_s1 + $0x330] sm:$0xff] }
  0x4c   :  { %v141_v7 = vld [vmem:[%s1918_s1 + $0x370] sm:$0xff] }
  0x4d   :  { %v145_v12 = vld [vmem:[%s1918_s1 + $0x390] sm:$0xff] }
  0x4e   :  { %930 = vmatpush1.bf16.xpose.msra.mxu1 %v1255_v32  ;;  %v1231_v32 = vcombine.low %v1574_v21, %v1579_v22  ;;  %v1234_v21 = vcombine.high %v1698_v17, %v1703_v18  ;;  %v65_v22 = vld [vmem:[%s1918_s1 + $0x110] sm:$0xff] }
  0x4f   :  { %931 = vmatprep.subr.bf16.mxu1 %v1272_v34  ;;  %v1258_v34 = vcombine.high %v49_v24, %v57_v27  ;;  %v153_v13 = vld [vmem:[%s1918_s1 + $0x3d0] sm:$0xff] }
  0x50   :  { %1094 = vmatpush1.bf16.xpose.msra.mxu0 %v1263_v33  ;;  %v1249_v33 = vcombine.low %v37_v14, %v45_v15  ;;  %v149_v14 = vld [vmem:[%s1918_s1 + $0x3b0] sm:$0xff] }
  0x51   :  { %1095 = vmatprep.subr.bf16.mxu0 %v1280_v35  ;;  %v1266_v35 = vcombine.high %v53_v28, %v61_v26  ;;  %v157_v15 = vld [vmem:[%s1918_s1 + $0x3f0] sm:$0xff] }
  0x56   :  { %932 = vmatpush1.bf16.xpose.msra.mxu1 %v1271_v40  ;;  %v1257_v40 = vcombine.low %v49_v24, %v57_v27  ;;  %v34_v24 = vld [vmem:[%s1918_s1 + $0x18] sm:$0xff] }
  0x57   :  { %933 = vmatprep.subr.bf16.mxu1 %v1288_v42  ;;  %v1274_v42 = vcombine.high %v65_v22, %v73_v37  ;;  %v42_v27 = vld [vmem:[%s1918_s1 + $0x58] sm:$0xff] }
  0x58   :  { %1096 = vmatpush1.bf16.xpose.msra.mxu0 %v1279_v41  ;;  %v1265_v41 = vcombine.low %v53_v28, %v61_v26  ;;  %v38_v28 = vld [vmem:[%s1918_s1 + $0x38] sm:$0xff]  ;;  %v1353_v26 = vcombine.low %v145_v12, %v153_v13 }
  0x59   :  { %1097 = vmatprep.subr.bf16.mxu0 %v1296_v43  ;;  %v1282_v43 = vcombine.high %v69_v38, %v77_v39 }
  0x5e   :  { %934 = vmatpush1.bf16.xpose.msra.mxu1 %v1287_v48  ;;  %v1273_v48 = vcombine.low %v65_v22, %v73_v37  ;;  %v62_v22 = vld [vmem:[%s1918_s1 + $0xf8] sm:$0xff] }
  0x5f   :  { %935 = vmatprep.subr.bf16.mxu1 %v1304_v50  ;;  %v1290_v50 = vcombine.high %v81_v44, %v89_v45  ;;  %v1810_v37 = vld [vmem:[%s1919_s0 + $0x18] sm:$0xff] }
  0x60   :  { %1098 = vmatpush1.bf16.xpose.msra.mxu0 %v1295_v49  ;;  %v1281_v49 = vcombine.low %v69_v38, %v77_v39  ;;  %v1815_v38 = vld [vmem:[%s1919_s0 + $0x58] sm:$0xff]  ;;  %v1243_v39 = vcombine.low %v34_v24, %v42_v27 }
  0x61   :  { %1099 = vmatprep.subr.bf16.mxu0 %v1312_v51  ;;  %v1298_v51 = vcombine.high %v85_v46, %v93_v47 }
  0x66   :  { %936 = vmatpush1.bf16.xpose.msra.mxu1 %v1303_v56  ;;  %v1289_v56 = vcombine.low %v81_v44, %v89_v45  ;;  %v1228_v44 = vcombine.high %v1810_v37, %v1815_v38  ;;  %v74_v45 = vld [vmem:[%s1918_s1 + $0x158] sm:$0xff] }
  0x67   :  { %937 = vmatprep.subr.bf16.mxu1 %v1320_v58  ;;  %v1306_v58 = vcombine.high %v97_v52, %v105_v53 }
  0x68   :  { %1100 = vmatpush1.bf16.xpose.msra.mxu0 %v1311_v57  ;;  %v1297_v57 = vcombine.low %v85_v46, %v93_v47  ;;  %v70_v46 = vld [vmem:[%s1918_s1 + $0x138] sm:$0xff] }
  0x69   :  { %1101 = vmatprep.subr.bf16.mxu0 %v1328_v59  ;;  %v1314_v59 = vcombine.high %v101_v54, %v109_v55  ;;  %v78_v47 = vld [vmem:[%s1918_s1 + $0x178] sm:$0xff] }
  0x6e   :  { %938 = vmatpush1.bf16.xpose.msra.mxu1 %v1319_v0  ;;  %v1305_v0 = vcombine.low %v97_v52, %v105_v53  ;;  %v82_v52 = vld [vmem:[%s1918_s1 + $0x198] sm:$0xff] }
  0x6f   :  { %939 = vmatprep.subr.bf16.mxu1 %v1336_v2  ;;  %v1322_v2 = vcombine.high %v113_v60, %v121_v61  ;;  %v90_v53 = vld [vmem:[%s1918_s1 + $0x1d8] sm:$0xff] }
  0x70   :  { %1102 = vmatpush1.bf16.xpose.msra.mxu0 %v1327_v1  ;;  %v1313_v1 = vcombine.low %v101_v54, %v109_v55  ;;  %v86_v54 = vld [vmem:[%s1918_s1 + $0x1b8] sm:$0xff] }
  0x71   :  { %1103 = vmatprep.subr.bf16.mxu0 %v1344_v3  ;;  %v1330_v3 = vcombine.high %v117_v62, %v125_v63  ;;  %v94_v55 = vld [vmem:[%s1918_s1 + $0x1f8] sm:$0xff] }
  0x76   :  { %940 = vmatpush1.bf16.xpose.msra.mxu1 %v1335_v8  ;;  %v1321_v8 = vcombine.low %v113_v60, %v121_v61  ;;  %v98_v60 = vld [vmem:[%s1918_s1 + $0x218] sm:$0xff] }
  0x77   :  { %941 = vmatprep.subr.bf16.mxu1 %v1352_v10  ;;  %v1338_v10 = vcombine.high %v129_v4, %v137_v5  ;;  %v106_v61 = vld [vmem:[%s1918_s1 + $0x258] sm:$0xff] }
  0x78   :  { %1104 = vmatpush1.bf16.xpose.msra.mxu0 %v1343_v9  ;;  %v1329_v9 = vcombine.low %v117_v62, %v125_v63  ;;  %v102_v62 = vld [vmem:[%s1918_s1 + $0x238] sm:$0xff] }
  0x79   :  { %1105 = vmatprep.subr.bf16.mxu0 %v1360_v11  ;;  %v1346_v11 = vcombine.high %v133_v6, %v141_v7  ;;  %v110_v63 = vld [vmem:[%s1918_s1 + $0x278] sm:$0xff] }
  0x7e   :  { %942 = vmatpush1.bf16.xpose.msra.mxu1 %v1351_v16  ;;  %v1337_v16 = vcombine.low %v129_v4, %v137_v5  ;;  %v114_v4 = vld [vmem:[%s1918_s1 + $0x298] sm:$0xff] }
  0x7f   :  { %968 = vmatprep.subr.bf16.mxu1 %v1242_v20  ;;  %v1354_v20 = vcombine.high %v145_v12, %v153_v13  ;;  %v122_v5 = vld [vmem:[%s1918_s1 + $0x2d8] sm:$0xff] }
  0x80   :  { %1106 = vmatpush1.bf16.xpose.msra.mxu0 %v1359_v19  ;;  %v1345_v19 = vcombine.low %v133_v6, %v141_v7  ;;  %v118_v6 = vld [vmem:[%s1918_s1 + $0x2b8] sm:$0xff] }
  0x81   :  { %1132 = vmatprep.subr.bf16.mxu0 %v1250_v23  ;;  %v1362_v23 = vcombine.high %v149_v14, %v157_v15  ;;  %v126_v7 = vld [vmem:[%s1918_s1 + $0x2f8] sm:$0xff] }
  0x82   :  { %v130_v12 = vld [vmem:[%s1918_s1 + $0x318] sm:$0xff] }
  0x83   :  { %v138_v13 = vld [vmem:[%s1918_s1 + $0x358] sm:$0xff] }
  0x85   :  { %960 = vmatmul.mubr.bf16.vlgmr.msra.gmra.mrb[0].mxu1 %v1223_v25  ;;  %v46_v25 = vld [vmem:[%s1918_s1 + $0x78] sm:$0xff] }
  0x86   :  { %969 = vmatpush1.bf16.xpose.msra.mxu1 %v1241_v31  ;;  %1000 = vmatprep.mubr.bf16.mxu1 %v1226_v36  ;;  %v1361_v31 = vcombine.low %v149_v14, %v157_v15  ;;  %v54_v36 = vld [vmem:[%s1918_s1 + $0xb8] sm:$0xff] }
  0x87   :  { %1124 = vmatmul.mubr.bf16.vlgmr.msra.gmra.mrb[0].mxu0 %v1231_v32  ;;  %970 = vmatprep.subr.bf16.mxu1 %v1258_v34  ;;  %v1244_v32 = vcombine.high %v34_v24, %v42_v27  ;;  %v50_v34 = vld [vmem:[%s1918_s1 + $0x98] sm:$0xff] }
  0x88   :  { %1133 = vmatpush1.bf16.xpose.msra.mxu0 %v1249_v33  ;;  %1164 = vmatprep.mubr.bf16.mxu0 %v1234_v21  ;;  %v1252_v33 = vcombine.high %v38_v28, %v46_v25  ;;  %v1225_v21 = vcombine.low %v1686_v29, %v1691_v30  ;;  %v1822_v29 = vld [vmem:[%s1919_s0 + $0x38] sm:$0xff] }
  0x89   :  { %1134 = vmatprep.subr.bf16.mxu0 %v1266_v35  ;;  %v58_v35 = vld [vmem:[%s1918_s1 + $0xd8] sm:$0xff] }
  0x8a   :  { %v1827_v30 = vld [vmem:[%s1919_s0 + $0x78] sm:$0xff] }
  0x8b   :  { %v134_v14 = vld [vmem:[%s1918_s1 + $0x338] sm:$0xff] }
  0x8c   :  { %v142_v15 = vld [vmem:[%s1918_s1 + $0x378] sm:$0xff] }
  0x8d   :  { %v146_v24 = vld [vmem:[%s1918_s1 + $0x398] sm:$0xff] }
  0x8e   :  { %971 = vmatpush1.bf16.xpose.msra.mxu1 %v1257_v40  ;;  %v1233_v40 = vcombine.low %v1698_v17, %v1703_v18  ;;  %v1236_v17 = vcombine.high %v1822_v29, %v1827_v30  ;;  %v66_v18 = vld [vmem:[%s1918_s1 + $0x118] sm:$0xff] }
  0x8f   :  { %972 = vmatprep.subr.bf16.mxu1 %v1274_v42  ;;  %v1260_v42 = vcombine.high %v50_v34, %v58_v35  ;;  %v154_v27 = vld [vmem:[%s1918_s1 + $0x3d8] sm:$0xff] }
  0x90   :  { %1135 = vmatpush1.bf16.xpose.msra.mxu0 %v1265_v41  ;;  %v1251_v41 = vcombine.low %v38_v28, %v46_v25  ;;  %v150_v28 = vld [vmem:[%s1918_s1 + $0x3b8] sm:$0xff] }
  0x91   :  { %1136 = vmatprep.subr.bf16.mxu0 %v1282_v43  ;;  %v1268_v43 = vcombine.high %v54_v36, %v62_v22  ;;  %v158_v25 = vld [vmem:[%s1918_s1 + $0x3f8] sm:$0xff] }
  0x96   :  { %973 = vmatpush1.bf16.xpose.msra.mxu1 %v1273_v48  ;;  %v1259_v48 = vcombine.low %v50_v34, %v58_v35  ;;  %v1355_v34 = vcombine.low %v146_v24, %v154_v27  ;;  %v1363_v35 = vcombine.low %v150_v28, %v158_v25 }
  0x97   :  { %974 = vmatprep.subr.bf16.mxu1 %v1290_v50  ;;  %v1276_v50 = vcombine.high %v66_v18, %v74_v45 }
  0x98   :  { %1137 = vmatpush1.bf16.xpose.msra.mxu0 %v1281_v49  ;;  %v1267_v49 = vcombine.low %v54_v36, %v62_v22  ;;  %v1227_v36 = vcombine.low %v1810_v37, %v1815_v38  ;;  %v1220_v22 = vld [vmem:[%s1920_s2] ss:$0 sm:$0xff] }
  0x99   :  { %1138 = vmatprep.subr.bf16.mxu0 %v1298_v51  ;;  %v1284_v51 = vcombine.high %v70_v46, %v78_v47 }
  0x9e   :  { %975 = vmatpush1.bf16.xpose.msra.mxu1 %v1289_v56  ;;  %v1275_v56 = vcombine.low %v66_v18, %v74_v45 }
  0x9f   :  { %976 = vmatprep.subr.bf16.mxu1 %v1306_v58  ;;  %v1292_v58 = vcombine.high %v82_v52, %v90_v53 }
  0xa0   :  { %1139 = vmatpush1.bf16.xpose.msra.mxu0 %v1297_v57  ;;  %v1283_v57 = vcombine.low %v70_v46, %v78_v47 }
  0xa1   :  { %1140 = vmatprep.subr.bf16.mxu0 %v1314_v59  ;;  %v1300_v59 = vcombine.high %v86_v54, %v94_v55 }
  0xa6   :  { %977 = vmatpush1.bf16.xpose.msra.mxu1 %v1305_v0  ;;  %v1291_v0 = vcombine.low %v82_v52, %v90_v53 }
  0xa7   :  { %978 = vmatprep.subr.bf16.mxu1 %v1322_v2  ;;  %v1308_v2 = vcombine.high %v98_v60, %v106_v61 }
  0xa8   :  { %1141 = vmatpush1.bf16.xpose.msra.mxu0 %v1313_v1  ;;  %v1299_v1 = vcombine.low %v86_v54, %v94_v55 }
  0xa9   :  { %1142 = vmatprep.subr.bf16.mxu0 %v1330_v3  ;;  %v1316_v3 = vcombine.high %v102_v62, %v110_v63 }
  0xae   :  { %979 = vmatpush1.bf16.xpose.msra.mxu1 %v1321_v8  ;;  %v1307_v8 = vcombine.low %v98_v60, %v106_v61 }
  0xaf   :  { %980 = vmatprep.subr.bf16.mxu1 %v1338_v10  ;;  %v1324_v10 = vcombine.high %v114_v4, %v122_v5 }
  0xb0   :  { %1143 = vmatpush1.bf16.xpose.msra.mxu0 %v1329_v9  ;;  %v1315_v9 = vcombine.low %v102_v62, %v110_v63 }
  0xb1   :  { %1144 = vmatprep.subr.bf16.mxu0 %v1346_v11  ;;  %v1332_v11 = vcombine.high %v118_v6, %v126_v7 }
  0xb6   :  { %981 = vmatpush1.bf16.xpose.msra.mxu1 %v1337_v16  ;;  %v1323_v16 = vcombine.low %v114_v4, %v122_v5 }
  0xb7   :  { %982 = vmatprep.subr.bf16.mxu1 %v1354_v20  ;;  %v1340_v20 = vcombine.high %v130_v12, %v138_v13 }
  0xb8   :  { %1145 = vmatpush1.bf16.xpose.msra.mxu0 %v1345_v19  ;;  %v1331_v19 = vcombine.low %v118_v6, %v126_v7 }
  0xb9   :  { %1146 = vmatprep.subr.bf16.mxu0 %v1362_v23  ;;  %v1348_v23 = vcombine.high %v134_v14, %v142_v15 }
  0xbe   :  { %983 = vmatpush1.bf16.xpose.msra.mxu1 %v1353_v26  ;;  %v1339_v26 = vcombine.low %v130_v12, %v138_v13 }
  0xbf   :  { %1009 = vmatprep.subr.bf16.mxu1 %v1244_v32  ;;  %v1356_v32 = vcombine.high %v146_v24, %v154_v27 }
  0xc0   :  { %1147 = vmatpush1.bf16.xpose.msra.mxu0 %v1361_v31  ;;  %v1347_v31 = vcombine.low %v134_v14, %v142_v15 }
  0xc1   :  { %1173 = vmatprep.subr.bf16.mxu0 %v1252_v33  ;;  %v1364_v33 = vcombine.high %v150_v28, %v158_v25 }
  0xc5   :  { %1001 = vmatmul.mubr.bf16.vlgmr.msra.gmra.mrb[0].mxu1 %v1225_v21  ;;  %v1235_v21 = vcombine.low %v1822_v29, %v1827_v30 }
  0xc6   :  { %1010 = vmatpush1.bf16.xpose.msra.mxu1 %v1243_v39  ;;  %1041 = vmatprep.mubr.bf16.mxu1 %v1228_v44 }
  0xc7   :  { %1165 = vmatmul.mubr.bf16.vlgmr.msra.gmra.mrb[0].mxu0 %v1233_v40  ;;  %1011 = vmatprep.subr.bf16.mxu1 %v1260_v42 }
  0xc8   :  { %1174 = vmatpush1.bf16.xpose.msra.mxu0 %v1251_v41  ;;  %1205 = vmatprep.mubr.bf16.mxu0 %v1236_v17 }
  0xc9   :  { %1175 = vmatprep.subr.bf16.mxu0 %v1268_v43 }
  0xce   :  { %1012 = vmatpush1.bf16.xpose.msra.mxu1 %v1259_v48 }
  0xcf   :  { %1013 = vmatprep.subr.bf16.mxu1 %v1276_v50 }
  0xd0   :  { %1176 = vmatpush1.bf16.xpose.msra.mxu0 %v1267_v49 }
  0xd1   :  { %1177 = vmatprep.subr.bf16.mxu0 %v1284_v51 }
  0xd6   :  { %1014 = vmatpush1.bf16.xpose.msra.mxu1 %v1275_v56 }
  0xd7   :  { %1015 = vmatprep.subr.bf16.mxu1 %v1292_v58 }
  0xd8   :  { %1178 = vmatpush1.bf16.xpose.msra.mxu0 %v1283_v57 }
  0xd9   :  { %1179 = vmatprep.subr.bf16.mxu0 %v1300_v59 }
  0xde   :  { %1016 = vmatpush1.bf16.xpose.msra.mxu1 %v1291_v0 }
  0xdf   :  { %1017 = vmatprep.subr.bf16.mxu1 %v1308_v2 }
  0xe0   :  { %1180 = vmatpush1.bf16.xpose.msra.mxu0 %v1299_v1 }
  0xe1   :  { %1181 = vmatprep.subr.bf16.mxu0 %v1316_v3 }
  0xe6   :  { %1018 = vmatpush1.bf16.xpose.msra.mxu1 %v1307_v8 }
  0xe7   :  { %1019 = vmatprep.subr.bf16.mxu1 %v1324_v10 }
  0xe8   :  { %1182 = vmatpush1.bf16.xpose.msra.mxu0 %v1315_v9 }
  0xe9   :  { %1183 = vmatprep.subr.bf16.mxu0 %v1332_v11 }
  0xee   :  { %1020 = vmatpush1.bf16.xpose.msra.mxu1 %v1323_v16 }
  0xef   :  { %1021 = vmatprep.subr.bf16.mxu1 %v1340_v20 }
  0xf0   :  { %1184 = vmatpush1.bf16.xpose.msra.mxu0 %v1331_v19 }
  0xf1   :  { %1185 = vmatprep.subr.bf16.mxu0 %v1348_v23 }
  0xf6   :  { %1022 = vmatpush1.bf16.xpose.msra.mxu1 %v1339_v26 }
  0xf7   :  { %1023 = vmatprep.subr.bf16.mxu1 %v1356_v32 }
  0xf8   :  { %1186 = vmatpush1.bf16.xpose.msra.mxu0 %v1347_v31 }
  0xf9   :  { %1187 = vmatprep.subr.bf16.mxu0 %v1364_v33 }
  0xfe   :  { %1024 = vmatpush1.bf16.xpose.msra.mxu1 %v1355_v34 }
 0x100   :  { %1188 = vmatpush1.bf16.xpose.msra.mxu0 %v1363_v35 }
 0x105   :  { %1042 = vmatmul.mubr.bf16.vlgmr.msra.gmra.mrb[0].mxu1 %v1227_v36 }
 0x107   :  { %1206 = vmatmul.mubr.bf16.vlgmr.msra.gmra.mrb[0].mxu0 %v1235_v21 }
 0x1d8   :  { %v1043_v39 = vpop.f32.mrb[0].mxu1 }
 0x1d9   :  { %v1365_v40 = vadd.f32 %v1220_v22, %v1043_v39  ;;  %v1045_v42 = vpop.f32.mrb[1].mxu1 }
 0x1da   :  { %v1207_v41 = vpop.f32.mrb[0].mxu0  ;;  %v1046_v44 = vpop.f32.mrb[2].mxu1 }
 0x1db   :  { %v1209_v43 = vpop.f32.mrb[1].mxu0  ;;  %v1366_v17 = vadd.f32 %v1365_v40, %v1207_v41  ;;  %v1367_v18 = vadd.f32 %v1220_v22, %v1046_v44  ;;  %v1048_v46 = vpop.f32.mrb[3].mxu1 }
 0x1dc   :  { %v1210_v45 = vpop.f32.mrb[2].mxu0 }
 0x1dd   :  { %v1212_v37 = vpop.f32.mrb[3].mxu0  ;;  %1214 = vst [vmem:[%s1921_s3] sm:$0xff] %v1366_v17  ;;  %v1368_v38 = vadd.f32 %v1367_v18, %v1210_v45 }
 0x1df   :  { %1215 = vst [vmem:[%s1921_s3 + $0x8] sm:$0xff] %v1368_v38 }

</bundles_post_ra>
